<compile_context>
chip_gen: v5e
topology: v5e:2x2
jax: 0.10.0
libtpu: 0.0.40
codegen_flags: <defaults>
</compile_context>

<pallas_src>
import math
import jax
import jax.numpy as jnp
from jax.experimental import pallas as pl
from jax.experimental.pallas import tpu as pltpu

# ---------------- module hyper-parameters (deterministic, in-script) ----------
GAMMAS = jnp.array([0.5, 0.9, 0.99], dtype=jnp.float32)   # len(gammas) = 3
NUM_GAMMAS = int(GAMMAS.shape[0])
NUM_ACTIONS = 4                                            # env.single_action_space.n
OBS_DIM = 16                                               # env.single_observation_space.shape[0]
HIDDEN1 = 120
HIDDEN2 = 84
HIDDEN1_PAD = 128                                          # lane-aligned padding of 120
HIDDEN2_PAD = 128                                          # lane-aligned padding of 84
OUT_DIM = NUM_GAMMAS * NUM_ACTIONS                         # 12
OUT_DIM_PAD = 128                                          # lane-dense padded output width
BIAS_CAT = HIDDEN1_PAD + HIDDEN2_PAD + OUT_DIM_PAD         # 384

R_MIN, R_MAX = -1.0, 1.0
NEURAL_NET_MULTIPLIER = 1.0
ADDITIVE_CONSTANT = 0.0
ADDITIVE_MULTIPLE_OF_VMAX = 0.0
MAXIMUM_VALUE = R_MAX / (1.0 - GAMMAS)                     # self._maximum_value

MAX_BATCH_TILE = 4096                                      # rows per grid step (cap)
TARGET_GRID_STEPS = 2                                      # aim for ~2 steps (v7x: 2 TCs)


def _round_up(n, m):
    return ((n + m - 1) // m) * m


# ---------------- Pallas kernel: the whole MLP hot path -----------------------
def _mlp_kernel(x_ref, w1_ref, w2_ref, w3_ref, b_ref, o_ref):
    # Matmul operands in bf16 (MXU-native), f32 accumulation + f32 elementwise.
    x = x_ref[...]
    if x.dtype != jnp.bfloat16:          # static (trace-time) branch
        x = x.astype(jnp.bfloat16)

    # Concatenated biases, sliced at 128-lane (tile-aligned) boundaries.
    b1 = b_ref[:, 0:HIDDEN1_PAD]
    b2 = b_ref[:, HIDDEN1_PAD:HIDDEN1_PAD + HIDDEN2_PAD]
    b3 = b_ref[:, HIDDEN1_PAD + HIDDEN2_PAD:BIAS_CAT]

    h1 = jnp.dot(x, w1_ref[...], preferred_element_type=jnp.float32) + b1
    h1 = jnp.maximum(h1, 0.0).astype(jnp.bfloat16)
    h2 = jnp.dot(h1, w2_ref[...], preferred_element_type=jnp.float32) + b2
    h2 = jnp.maximum(h2, 0.0).astype(jnp.bfloat16)
    # neural_net_multiplier is already folded into w3/b3; padded output columns
    # are exact zeros (zero weights + zero bias).  Lane-dense (tb, 128) store.
    out = jnp.dot(h2, w3_ref[...], preferred_element_type=jnp.float32) + b3
    o_ref[...] = out.astype(o_ref.dtype)


def many_gamma_q_forward(x, prepared_params, *, out_dtype=jnp.float32,
                         max_batch_tile=MAX_BATCH_TILE):
    """Forward pass of ManyGammaQNetwork (flat-NN path).

    x: (B, OBS_DIM) float32 or bfloat16 (pass bf16 if the producer emits it:
       halves the input HBM stream and removes the in-kernel cast).
    prepared_params: output of prepare_params() (padded / bf16 / multiplier-folded)
    out_dtype: kernel store dtype of the padded output slab.  jnp.float32 by
       default; set jnp.bfloat16 on v5e to halve the lane-dense writeback.
    returns: (B, NUM_GAMMAS, NUM_ACTIONS) float32
    """
    assert x.ndim == 2 and x.shape[1] == OBS_DIM, x.shape
    assert x.dtype in (jnp.float32, jnp.bfloat16), x.dtype
    w1, w2, w3, b_cat = prepared_params
    B = x.shape[0]

    # Batch tile: multiple of 8 sublanes, sized so the grid has a small fixed
    # number of steps (~TARGET_GRID_STEPS) -> per-step overhead stays negligible
    # and v7x's two TensorCores both get real rows.  Capped so per-step VMEM
    # (x + padded-out tiles, double/triple buffered) stays in the low MBs.
    tb = min(max_batch_tile, max(8, _round_up(pl.cdiv(B, TARGET_GRID_STEPS), 8)))
    b_pad = _round_up(B, tb)
    num_steps = b_pad // tb
    if b_pad != B:
        x = jnp.pad(x, ((0, b_pad - B), (0, 0)))
    grid = (num_steps,)

    batch_map = lambda i: (i, 0)
    const_map = lambda i: (0, 0)   # weights/biases resident across all grid steps

    # Deeper input pipelining when there are enough steps to overlap (v5e: the
    # exposed HBM DMA on the x stream is the long pole, compute is negligible).
    if num_steps >= 3:
        x_spec = pl.BlockSpec((tb, OBS_DIM), batch_map, pipeline_mode=pl.Buffered(3))
    else:
        x_spec = pl.BlockSpec((tb, OBS_DIM), batch_map)

    out_flat = pl.pallas_call(
        _mlp_kernel,
        out_shape=jax.ShapeDtypeStruct((b_pad, OUT_DIM_PAD), out_dtype),
        grid_spec=pltpu.PrefetchScalarGridSpec(
            num_scalar_prefetch=0,
            grid=grid,
            in_specs=[
                x_spec,
                pl.BlockSpec((OBS_DIM, HIDDEN1_PAD), const_map),
                pl.BlockSpec((HIDDEN1_PAD, HIDDEN2_PAD), const_map),
                pl.BlockSpec((HIDDEN2_PAD, OUT_DIM_PAD), const_map),
                pl.BlockSpec((1, BIAS_CAT), const_map),
            ],
            out_specs=pl.BlockSpec((tb, OUT_DIM_PAD), batch_map),
        ),
        compiler_params=pltpu.CompilerParams(
            dimension_semantics=("parallel",),   # v7x: shard batch across both TCs
        ),
    )(x, w1, w2, w3, b_cat)

    out = out_flat[:B, :OUT_DIM]
    if out.dtype != jnp.float32:
        out = out.astype(jnp.float32)
    output = out.reshape(-1, NUM_GAMMAS, NUM_ACTIONS)

    # Python-level conditionals in the PyTorch forward (skipped when 0.0).
    if ADDITIVE_CONSTANT:
        output = output + ADDITIVE_CONSTANT
    if ADDITIVE_MULTIPLE_OF_VMAX:
        output = output + ADDITIVE_MULTIPLE_OF_VMAX * MAXIMUM_VALUE[None, :, None]
    return output


# ---------------- deterministic parameter init (PyTorch-Linear-style) ---------
def _init_linear(key, fan_in, fan_out):
    kw, kb = jax.random.split(key)
    bound = 1.0 / math.sqrt(fan_in)
    w = jax.random.uniform(kw, (fan_in, fan_out), jnp.float32, -bound, bound)
    b = jax.random.uniform(kb, (1, fan_out), jnp.float32, -bound, bound)
    return w, b


def make_raw_params(key):
    """Unpadded f32 params with the exact PyTorch-module shapes."""
    k1, k2, k3 = jax.random.split(key, 3)
    w1, b1 = _init_linear(k1, OBS_DIM, HIDDEN1)
    w2, b2 = _init_linear(k2, HIDDEN1, HIDDEN2)
    w3, b3 = _init_linear(k3, HIDDEN2, OUT_DIM)
    return (w1, b1, w2, b2, w3, b3)


def prepare_params(raw_params):
    """Pad hidden AND output dims to 128, fold neural_net_multiplier, cast
    matmul operands to bf16, concatenate biases into one (1, 384) f32 array."""
    w1, b1, w2, b2, w3, b3 = raw_params

    # Fold the (compile-time constant) multiplier into the last layer.
    w3 = w3 * NEURAL_NET_MULTIPLIER
    b3 = b3 * NEURAL_NET_MULTIPLIER

    # Zero-pad: padded hidden/output units get 0 weight and 0 bias -> ReLU(0)=0
    # and 0 contribution downstream / in padded output columns, so exact.
    w1p = jnp.zeros((OBS_DIM, HIDDEN1_PAD), jnp.float32).at[:, :HIDDEN1].set(w1)
    w2p = jnp.zeros((HIDDEN1_PAD, HIDDEN2_PAD), jnp.float32).at[:HIDDEN1, :HIDDEN2].set(w2)
    w3p = jnp.zeros((HIDDEN2_PAD, OUT_DIM_PAD), jnp.float32).at[:HIDDEN2, :OUT_DIM].set(w3)
    b1p = jnp.zeros((1, HIDDEN1_PAD), jnp.float32).at[:, :HIDDEN1].set(b1)
    b2p = jnp.zeros((1, HIDDEN2_PAD), jnp.float32).at[:, :HIDDEN2].set(b2)
    b3p = jnp.zeros((1, OUT_DIM_PAD), jnp.float32).at[:, :OUT_DIM].set(b3)
    b_cat = jnp.concatenate([b1p, b2p, b3p], axis=1)       # (1, 384) f32

    # bf16 matmul operands; biases stay f32 (added post-accumulation).
    return (w1p.astype(jnp.bfloat16),
            w2p.astype(jnp.bfloat16),
            w3p.astype(jnp.bfloat16),
            b_cat)


# ---------------- pure-JAX references -----------------------------------------
def _ref_forward_bf16(x, prepared_params):
    """Same math as the kernel (bf16 operands, f32 accumulate)."""
    w1, w2, w3, b = prepared_params
    b1 = b[:, 0:HIDDEN1_PAD]
    b2 = b[:, HIDDEN1_PAD:HIDDEN1_PAD + HIDDEN2_PAD]
    b3 = b[:, HIDDEN1_PAD + HIDDEN2_PAD:BIAS_CAT]
    xb = x.astype(jnp.bfloat16)
    h1 = jnp.maximum(jnp.dot(xb, w1, preferred_element_type=jnp.float32) + b1, 0.0)
    h2 = jnp.maximum(jnp.dot(h1.astype(jnp.bfloat16), w2,
                             preferred_element_type=jnp.float32) + b2, 0.0)
    out = jnp.dot(h2.astype(jnp.bfloat16), w3,
                  preferred_element_type=jnp.float32) + b3
    return out[:, :OUT_DIM].reshape(-1, NUM_GAMMAS, NUM_ACTIONS)


def _ref_forward_f32(x, raw_params):
    """Exact f32 PyTorch-equivalent forward (sanity check only)."""
    w1, b1, w2, b2, w3, b3 = raw_params
    h1 = jnp.maximum(x @ w1 + b1, 0.0)
    h2 = jnp.maximum(h1 @ w2 + b2, 0.0)
    out = (h2 @ w3 + b3) * NEURAL_NET_MULTIPLIER
    return out.reshape(-1, NUM_GAMMAS, NUM_ACTIONS)


if __name__ == "__main__":
    root = jax.random.PRNGKey(0)
    k_params, k_x1, k_x2 = jax.random.split(root, 3)

    raw_params = make_raw_params(k_params)
    params = prepare_params(raw_params)

    # --- test 1: small batch, f32 input, default tiling ---------------------
    B1 = 8
    x1 = jax.random.normal(k_x1, (B1, OBS_DIM), dtype=jnp.float32)
    out1 = many_gamma_q_forward(x1, params)
    jax.block_until_ready(out1)
    assert out1.shape == (B1, NUM_GAMMAS, NUM_ACTIONS), out1.shape
    ref1 = _ref_forward_bf16(x1, params)
    assert jnp.allclose(out1, ref1, atol=2e-4, rtol=2e-4), (
        float(jnp.max(jnp.abs(out1 - ref1))))
    ref1_f32 = _ref_forward_f32(x1, raw_params)
    assert jnp.allclose(out1, ref1_f32, atol=5e-2, rtol=5e-2), (
        float(jnp.max(jnp.abs(out1 - ref1_f32))))

    # --- test 2: ragged batch -> 2-step "parallel" grid + batch padding -----
    B2 = 50
    x2 = jax.random.normal(k_x2, (B2, OBS_DIM), dtype=jnp.float32)
    out2 = many_gamma_q_forward(x2, params)
    jax.block_until_ready(out2)
    assert out2.shape == (B2, NUM_GAMMAS, NUM_ACTIONS), out2.shape
    ref2 = _ref_forward_bf16(x2, params)
    assert jnp.allclose(out2, ref2, atol=2e-4, rtol=2e-4), (
        float(jnp.max(jnp.abs(out2 - ref2))))

    # --- test 3: force >=3 grid steps -> exercises Buffered(3) input stream --
    out3 = many_gamma_q_forward(x2, params, max_batch_tile=16)
    jax.block_until_ready(out3)
    assert jnp.allclose(out3, ref2, atol=2e-4, rtol=2e-4), (
        float(jnp.max(jnp.abs(out3 - ref2))))

    # --- test 4: bf16 input + bf16 lane-dense writeback (v5e-friendly path) --
    out4 = many_gamma_q_forward(x1.astype(jnp.bfloat16), params,
                                out_dtype=jnp.bfloat16)
    jax.block_until_ready(out4)
    assert out4.shape == (B1, NUM_GAMMAS, NUM_ACTIONS), out4.shape
    assert jnp.allclose(out4, ref1, atol=1e-2, rtol=1e-2), (
        float(jnp.max(jnp.abs(out4 - ref1))))

    print("KERNEL_OK")
</pallas_src>

<mosaic_0001>
module attributes {stable_mosaic.version = 11 : i64} {
  func.func @_mlp_kernel(%arg0: i32, %arg1: memref<8x16xf32, #tpu.memory_space<vmem>>, %arg2: memref<16x128xbf16, #tpu.memory_space<vmem>>, %arg3: memref<128x128xbf16, #tpu.memory_space<vmem>>, %arg4: memref<128x128xbf16, #tpu.memory_space<vmem>>, %arg5: memref<1x384xf32, #tpu.memory_space<vmem>>, %arg6: memref<8x128xf32, #tpu.memory_space<vmem>>) attributes {dimension_semantics = [#tpu.dimension_semantics<parallel>], iteration_bounds = array<i64: 1>, scalar_prefetch = 0 : i64, scratch_operands = 0 : i64, tpu.core_type = #tpu.core_type<tc>, window_params = [{transform_indices = @transform_0, window_bounds = array<i64: 8, 16>}, {pipeline_mode = #tpu.pipeline_mode<synchronous>, transform_indices = @transform_1, window_bounds = array<i64: 16, 128>}, {pipeline_mode = #tpu.pipeline_mode<synchronous>, transform_indices = @transform_2, window_bounds = array<i64: 128, 128>}, {pipeline_mode = #tpu.pipeline_mode<synchronous>, transform_indices = @transform_3, window_bounds = array<i64: 128, 128>}, {pipeline_mode = #tpu.pipeline_mode<synchronous>, transform_indices = @transform_4, window_bounds = array<i64: 1, 384>}, {transform_indices = @transform_5, window_bounds = array<i64: 8, 128>}]} {
    %c0 = arith.constant 0 : index
    %c0_0 = arith.constant 0 : index
    %0 = vector.load %arg1[%c0, %c0_0] : memref<8x16xf32, #tpu.memory_space<vmem>>, vector<8x16xf32>
    %1 = arith.truncf %0 : vector<8x16xf32> to vector<8x16xbf16>
    %c0_1 = arith.constant 0 : index
    %c0_2 = arith.constant 0 : index
    %2 = vector.load %arg5[%c0_1, %c0_2] : memref<1x384xf32, #tpu.memory_space<vmem>>, vector<1x128xf32>
    %c0_3 = arith.constant 0 : index
    %c128 = arith.constant 128 : index
    %3 = vector.load %arg5[%c0_3, %c128] : memref<1x384xf32, #tpu.memory_space<vmem>>, vector<1x128xf32>
    %c0_4 = arith.constant 0 : index
    %c256 = arith.constant 256 : index
    %4 = vector.load %arg5[%c0_4, %c256] : memref<1x384xf32, #tpu.memory_space<vmem>>, vector<1x128xf32>
    %c0_5 = arith.constant 0 : index
    %c0_6 = arith.constant 0 : index
    %5 = vector.load %arg2[%c0_5, %c0_6] : memref<16x128xbf16, #tpu.memory_space<vmem>>, vector<16x128xbf16>
    %cst = arith.constant dense<0.000000e+00> : vector<8x128xf32>
    %6 = tpu.matmul %1, %5, %cst {dimension_numbers = #tpu.dot_dimension_numbers<[1], [0], [0], [1], [0, 0, 1, 1], [], []>} : vector<8x16xbf16>, vector<16x128xbf16>, vector<8x128xf32> -> vector<8x128xf32>
    %7 = vector.broadcast %2 : vector<1x128xf32> to vector<8x128xf32>
    %8 = arith.addf %6, %7 : vector<8x128xf32>
    %cst_7 = arith.constant 0.000000e+00 : f32
    %9 = vector.broadcast %cst_7 : f32 to vector<8x128xf32>
    %10 = arith.maximumf %8, %9 : vector<8x128xf32>
    %11 = arith.truncf %10 : vector<8x128xf32> to vector<8x128xbf16>
    %c0_8 = arith.constant 0 : index
    %c0_9 = arith.constant 0 : index
    %12 = vector.load %arg3[%c0_8, %c0_9] : memref<128x128xbf16, #tpu.memory_space<vmem>>, vector<128x128xbf16>
    %cst_10 = arith.constant dense<0.000000e+00> : vector<8x128xf32>
    %13 = tpu.matmul %11, %12, %cst_10 {dimension_numbers = #tpu.dot_dimension_numbers<[1], [0], [0], [1], [0, 0, 1, 1], [], []>} : vector<8x128xbf16>, vector<128x128xbf16>, vector<8x128xf32> -> vector<8x128xf32>
    %14 = vector.broadcast %3 : vector<1x128xf32> to vector<8x128xf32>
    %15 = arith.addf %13, %14 : vector<8x128xf32>
    %cst_11 = arith.constant 0.000000e+00 : f32
    %16 = vector.broadcast %cst_11 : f32 to vector<8x128xf32>
    %17 = arith.maximumf %15, %16 : vector<8x128xf32>
    %18 = arith.truncf %17 : vector<8x128xf32> to vector<8x128xbf16>
    %c0_12 = arith.constant 0 : index
    %c0_13 = arith.constant 0 : index
    %19 = vector.load %arg4[%c0_12, %c0_13] : memref<128x128xbf16, #tpu.memory_space<vmem>>, vector<128x128xbf16>
    %cst_14 = arith.constant dense<0.000000e+00> : vector<8x128xf32>
    %20 = tpu.matmul %18, %19, %cst_14 {dimension_numbers = #tpu.dot_dimension_numbers<[1], [0], [0], [1], [0, 0, 1, 1], [], []>} : vector<8x128xbf16>, vector<128x128xbf16>, vector<8x128xf32> -> vector<8x128xf32>
    %21 = vector.broadcast %4 : vector<1x128xf32> to vector<8x128xf32>
    %22 = arith.addf %20, %21 : vector<8x128xf32>
    %c0_15 = arith.constant 0 : index
    %c0_16 = arith.constant 0 : index
    %23 = vector.load %arg6[%c0_15, %c0_16] : memref<8x128xf32, #tpu.memory_space<vmem>>, vector<8x128xf32>
    tpu.vector_store %arg6[%c0_15, %c0_16], %22 {strides = array<i32>} : memref<8x128xf32, #tpu.memory_space<vmem>>, vector<8x128xf32>,
    return
  }
  func.func @transform_0(%arg0: i32) -> (i32, i32) {
    %c0_i32 = arith.constant 0 : i32
    %c0_i32_0 = arith.constant 0 : i32
    return %arg0, %c0_i32 : i32, i32
  }
  func.func @transform_1(%arg0: i32) -> (i32, i32) {
    %c0_i32 = arith.constant 0 : i32
    %c0_i32_0 = arith.constant 0 : i32
    %c0_i32_1 = arith.constant 0 : i32
    return %c0_i32, %c0_i32_0 : i32, i32
  }
  func.func @transform_2(%arg0: i32) -> (i32, i32) {
    %c0_i32 = arith.constant 0 : i32
    %c0_i32_0 = arith.constant 0 : i32
    %c0_i32_1 = arith.constant 0 : i32
    return %c0_i32, %c0_i32_0 : i32, i32
  }
  func.func @transform_3(%arg0: i32) -> (i32, i32) {
    %c0_i32 = arith.constant 0 : i32
    %c0_i32_0 = arith.constant 0 : i32
    %c0_i32_1 = arith.constant 0 : i32
    return %c0_i32, %c0_i32_0 : i32, i32
  }
  func.func @transform_4(%arg0: i32) -> (i32, i32) {
    %c0_i32 = arith.constant 0 : i32
    %c0_i32_0 = arith.constant 0 : i32
    %c0_i32_1 = arith.constant 0 : i32
    return %c0_i32, %c0_i32_0 : i32, i32
  }
  func.func @transform_5(%arg0: i32) -> (i32, i32) {
    %c0_i32 = arith.constant 0 : i32
    %c0_i32_0 = arith.constant 0 : i32
    return %arg0, %c0_i32 : i32, i32
  }
}

</mosaic_0001>

<bundles_post_ra>
// kernel: tpu_custom_call.1
= control target key start
LH: loop header
LB: loop body
LE: loop exit
PB: predicated region body
PF: predicated region fallthrough
CT: control target
= control target key end

     0   :  { %10 = vsyncpa [#allocation3], 0  ;;  %s585_s0 = inlined_call_operand.hbm [shape: f32[8,16], index: 0, kind: input, shape index: {}]   ;;  %s586_s1 = inlined_call_operand.hbm [shape: bf16[16,128], index: 1, kind: input, shape index: {}]   ;;  %s587_s2 = inlined_call_operand.hbm [shape: bf16[128,128], index: 2, kind: input, shape index: {}]   ;;  %s588_s3 = inlined_call_operand.hbm [shape: bf16[128,128], index: 3, kind: input, shape index: {}]   ;;  %s589_s4 = inlined_call_operand.vmem [shape: f32[1,384], index: 4, kind: input, shape index: {}]   ;;  %s590_s5 = inlined_call_operand.hbm [shape: f32[8,128], index: 5, kind: output, shape index: {}]  }
   0x1   :  { %11 = vsyncpa [#allocation6], 0 }
   0x2   :  { %12 = vsyncpa [#allocation9], 0  ;;  %s29_s20 = sshll.u32 %s586_s1, 4  ;;  %s30_s20 = int_to_ptr.hbm [resolvable:$true] %s29_s20 }
   0x3   :  { %13 = vsyncpa [#allocation4], 0  ;;  %s524_s21 = smov [#allocation5]   ;;  %s19_s25 = sshll.u32 %s585_s0, 4  ;;  %s20_s25 = int_to_ptr.hbm [resolvable:$true] %s19_s25 }
   0x4   :  { %s31_s22 = sshll.u32 %s524_s21, 4  ;;  %s525_s26 = smov 64   ;;  %s32_s22 = int_to_ptr.vmem [resolvable:$true] %s31_s22 }
   0x5   :  { %s526_s27 = smov 4   ;;  %s527_s28 = smov [#allocation2]  }
   0x6   :  { %37 = dma.hbm_to_vmem [thread:$0]  %s30_s20, 128, %s32_s22, [#allocation6], %s525_s26, %s525_s26, %s526_s27  }
   0x7   :  { %s21_s29 = sshll.u32 %s527_s28, 4  ;;  %s42_s7 = sshll.u32 %s587_s2, 4  ;;  %s22_s29 = int_to_ptr.vmem [resolvable:$true] %s21_s29  ;;  %s43_s7 = int_to_ptr.hbm [resolvable:$true] %s42_s7 }
   0x8   :  { %24 = dma.hbm_to_vmem [thread:$0]  %s20_s25, 128, %s22_s29, [#allocation3]  }
   0x9   :  { %s55_s9 = sshll.u32 %s588_s3, 4  ;;  %s528_s10 = smov [#allocation7]   ;;  %s56_s9 = int_to_ptr.hbm [resolvable:$true] %s55_s9 }
   0xa   :  { %s44_s11 = sshll.u32 %s528_s10, 4  ;;  %s529_s0 = smov [#allocation8]   ;;  %s45_s11 = int_to_ptr.vmem [resolvable:$true] %s44_s11 }
   0xb   :  { %50 = dma.hbm_to_vmem [thread:$0]  %s43_s7, 1024, %s45_s11, [#allocation6], %s525_s26, %s525_s26, %s526_s27  }
   0xc   :  { %s57_s12 = sshll.u32 %s529_s0, 4  ;;  %s58_s12 = int_to_ptr.vmem [resolvable:$true] %s57_s12 }
   0xd   :  { %63 = dma.hbm_to_vmem [thread:$0]  %s56_s9, 1024, %s58_s12, [#allocation9], %s525_s26, %s525_s26, %s526_s27  }
   0xe   :  { %516 = dma.done.wait [#allocation3], 128  }
   0xf   :  { %517 = vsyncadd [#allocation3], 4294967168 }
  0x10   :  { %518 = dma.done.wait [#allocation6], 1152  }
  0x11   :  { %519 = vsyncadd [#allocation6], 4294966144 }
  0x12   :  { %520 = dma.done.wait [#allocation9], 1024  }
  0x13   :  { %521 = vsyncadd [#allocation9], 4294966272  ;;  %v369_v0 = vld [vmem:[#allocation5] sm:$0xff]  ;;  %v83_v1 = vld [vmem:[#allocation2] sm:$0xff]  ;;  %vm99_vm0 = vcmask 130048   ;;  %s530_s17 = smov [#allocation10]  }
  0x14   :  { %v377_v2 = vld [vmem:[#allocation7 + $0x38] sm:$0xff]  ;;  %v84_v3 = vpack.c.bf16 %v83_v1, %v83_v1  ;;  %110 = vmatpush.bf16.msra.mxu0 %v369_v0  ;;  %v376_v4 = vld [vmem:[#allocation7 + $0x30] sm:$0xff]  ;;  %v375_v5 = vld [vmem:[#allocation7 + $0x28] sm:$0xff]  ;;  %s286_s18 = sshll.u32 %s530_s17, 4  ;;  %s288_s21 = sshll.u32 %s590_s5, 4  ;;  %s287_s18 = int_to_ptr.vmem [resolvable:$true] %s286_s18  ;;  %s289_s21 = int_to_ptr.hbm [resolvable:$true] %s288_s21 }
  0x15   :  { %185 = vmatpush.bf16.msra.mxu1 %v377_v2  ;;  %v374_v6 = vld [vmem:[#allocation7 + $0x20] sm:$0xff]  ;;  %v373_v7 = vld [vmem:[#allocation7 + $0x18] sm:$0xff]  ;;  %v372_v8 = vld [vmem:[#allocation7 + $0x10] sm:$0xff] }
  0x16   :  { %v371_v9 = vld [vmem:[#allocation7 + $0x8] sm:$0xff]  ;;  %v370_v10 = vld [vmem:[#allocation7] sm:$0xff]  ;;  %v385_v11 = vld [vmem:[#allocation8 + $0x38] sm:$0xff] }
  0x17   :  { %304 = vmatmul.msk.bf16.vlgmr.msra.gmra.mxu0 %vm99_vm0, %v84_v3  ;;  %267 = vmatpush.bf16.msra.mxu2 %v385_v11  ;;  %v384_v12 = vld [vmem:[#allocation8 + $0x30] sm:$0xff]  ;;  %v383_v13 = vld [vmem:[#allocation8 + $0x28] sm:$0xff]  ;;  %v382_v14 = vld [vmem:[#allocation8 + $0x20] sm:$0xff] }
  0x18   :  { %v381_v15 = vld [vmem:[#allocation8 + $0x18] sm:$0xff]  ;;  %v380_v16 = vld [vmem:[#allocation8 + $0x10] sm:$0xff]  ;;  %v379_v23 = vld [vmem:[#allocation8 + $0x8] sm:$0xff] }
  0x19   :  { %186 = vmatpush.bf16.msra.mxu1 %v376_v4  ;;  %v393_v17 = vld [vmem:[%s589_s4] ss:$0 sm:$0xff]  ;;  %v378_v24 = vld [vmem:[#allocation8] sm:$0xff]  ;;  %v394_v25 = vld [vmem:[%s589_s4 + $0x1] ss:$0 sm:$0xff] }
  0x1a   :  { %v395_v31 = vld [vmem:[%s589_s4 + $0x2] ss:$0 sm:$0xff] }
  0x1b   :  { %268 = vmatpush.bf16.msra.mxu2 %v384_v12 }
  0x1d   :  { %187 = vmatpush.bf16.msra.mxu1 %v375_v5 }
  0x1f   :  { %269 = vmatpush.bf16.msra.mxu2 %v383_v13 }
  0x21   :  { %188 = vmatpush.bf16.msra.mxu1 %v374_v6 }
  0x23   :  { %270 = vmatpush.bf16.msra.mxu2 %v382_v14 }
  0x25   :  { %189 = vmatpush.bf16.msra.mxu1 %v373_v7 }
  0x27   :  { %271 = vmatpush.bf16.msra.mxu2 %v381_v15 }
  0x29   :  { %190 = vmatpush.bf16.msra.mxu1 %v372_v8 }
  0x2b   :  { %272 = vmatpush.bf16.msra.mxu2 %v380_v16 }
  0x2d   :  { %191 = vmatpush.bf16.msra.mxu1 %v371_v9 }
  0x2f   :  { %273 = vmatpush.bf16.msra.mxu2 %v379_v23 }
  0x31   :  { %192 = vmatpush.bf16.msra.mxu1 %v370_v10 }
  0x33   :  { %274 = vmatpush.bf16.msra.mxu2 %v378_v24 }
  0x94   :  { %v112_v18 = vpop.f32.mrf.mxu0 }
  0x95   :  { %v113_v19 = vadd.f32 %v393_v17, %v112_v18 }
  0x97   :  { %v116_v20 = vmax.f32 %v113_v19, 0.0 }
  0x99   :  { %v117_v21 = vpack.c.bf16 %v116_v20, %v116_v20 }
  0x9b   :  { %193 = vmatmul.bf16.vlgmr.msra.gmra.mxu1 %v117_v21 }
  0x9c   :  { %v114_v22 = vpop.f32.mrf.mxu0 }
 0x118   :  { %v194_v26 = vpop.f32.mrf.mxu1 }
 0x119   :  { %v195_v27 = vadd.f32 %v394_v25, %v194_v26 }
 0x11b   :  { %v198_v28 = vmax.f32 %v195_v27, 0.0 }
 0x11d   :  { %v199_v29 = vpack.c.bf16 %v198_v28, %v198_v28 }
 0x11f   :  { %275 = vmatmul.bf16.vlgmr.msra.gmra.mxu2 %v199_v29 }
 0x120   :  { %v196_v30 = vpop.f32.mrf.mxu1 }
 0x1a2   :  { %v276_v32 = vpop.f32.mrf.mxu2 }
 0x1a3   :  { %v277_v33 = vadd.f32 %v395_v31, %v276_v32 }
 0x1a5   :  { %280 = vst [vmem:[#allocation10] sm:$0xff] %v277_v33 }
 0x1a6   :  { %291 = dma.vmem_to_hbm [thread:$0]  %s287_s18, 128, %s289_s21, [#allocation4]  }
 0x1aa   :  { %v278_v34 = vpop.f32.mrf.mxu2 }
 0x1ab   :  { %522 = dma.done.wait [#allocation4], 128  }
 0x1ac   :  { %523 = vsyncadd [#allocation4], 4294967168 }
 0x1ad   :  { %296 = vsyncpa [#allocation3], 1 }
 0x1ae   :  { %297 = vsyncpa [#allocation6], 1 }
 0x1af   :  { %298 = vsyncpa [#allocation9], 1 }
 0x1b0   :  { %299 = vsyncpa [#allocation4], 1 }

</bundles_post_ra>
